<compile_context>
chip_gen: v5e
topology: v5e:2x2
jax: 0.10.0
libtpu: 0.0.40
codegen_flags: <defaults>
</compile_context>

<pallas_src>
import math

import jax
import jax.numpy as jnp
from jax import lax
from jax.experimental import pallas as pl
from jax.experimental.pallas import tpu as pltpu


def _pair(v):
    return (v, v) if isinstance(v, int) else tuple(v)


def _round_up(x, m):
    return pl.cdiv(x, m) * m


def _vmem_capacity_bytes():
    """Physical VMEM of the local TPU; conservative default if unqueryable."""
    try:
        cap = getattr(pltpu.get_tpu_info(), "vmem_capacity_bytes", None)
        if cap:
            return int(cap)
    except Exception:
        pass
    return 64 * 1024 * 1024  # v7x per-TensorCore VMEM (smallest of v5e/v6e/v7x)


# ---------------------------------------------------------------------------
# Pallas kernel: one MXU matmul + f32 bias add per (M-tile, Cout-tile).
#   taps_ref : (tm, K)   streamed, compute dtype (bf16 by default)
#   w_ref    : (K, tn)   MTL-prescaled weight, (near-)resident
#   b_ref    : (1, tn)   folded bias (f32)
#   out_ref  : (tm, tn)  lane-dense output tile
# ---------------------------------------------------------------------------
def _conv_mtl_kernel(taps_ref, w_ref, b_ref, out_ref):
    acc = jnp.dot(taps_ref[...], w_ref[...], preferred_element_type=jnp.float32)
    out_ref[...] = (acc + b_ref[...]).astype(out_ref.dtype)


# ---------------------------------------------------------------------------
# Wrapper: Conv2dMtl.forward semantics
# ---------------------------------------------------------------------------
def conv2d_mtl_forward(x, weight, mtl_weight, bias, mtl_bias, *,
                       stride=1, padding=0, dilation=1, groups=1, MTL=False,
                       compute_dtype=jnp.bfloat16, tile_m=1024, tile_n=256):
    stride, padding, dilation = _pair(stride), _pair(padding), _pair(dilation)
    assert groups == 1  # TODO(synk): grouped conv (groups > 1) not implemented in this kernel

    out_dtype = x.dtype
    N, Cin, H, W = x.shape
    Cout, Cin_w, KH, KW = weight.shape
    assert Cin_w == Cin
    sh, sw = stride
    ph, pw = padding
    dh, dw = dilation
    OH = (H + 2 * ph - dh * (KH - 1) - 1) // sh + 1
    OW = (W + 2 * pw - dw * (KW - 1) - 1) // sw + 1
    M = N * OH * OW
    K = KH * KW * Cin

    # forward() branch: fold the MTL scaling into the (tiny) weight/bias once,
    # in f32, outside the hot loop.  MTL=False uses weight/bias unchanged.
    if MTL:
        w_eff = weight.astype(jnp.float32) * mtl_weight.astype(jnp.float32)
        b_eff = (bias.astype(jnp.float32) + mtl_bias.astype(jnp.float32)
                 ) if bias is not None else None
    else:
        w_eff = weight.astype(jnp.float32)
        b_eff = bias.astype(jnp.float32) if bias is not None else None

    # --- glue: pad + im2col into a single (M, K) slab in compute dtype ---
    # TODO(synk): on bandwidth-limited chips (v5e) the im2col slab still blows
    # the activation volume up KH*KW x in HBM; an in-kernel shifted-window DMA
    # (memory_space=pl.ANY + manual async copies) would remove that.
    xc = x.astype(compute_dtype)
    xp = jnp.pad(xc, ((0, 0), (0, 0), (ph, ph), (pw, pw)))
    xp = jnp.transpose(xp, (0, 2, 3, 1))  # (N, Hp, Wp, Cin)
    cols = []
    for kh in range(KH):
        for kw in range(KW):
            sl = lax.slice(
                xp,
                (0, kh * dh, kw * dw, 0),
                (N, kh * dh + (OH - 1) * sh + 1, kw * dw + (OW - 1) * sw + 1, Cin),
                (1, sh, sw, 1),
            )
            cols.append(sl.reshape(M, Cin))
    taps = jnp.concatenate(cols, axis=1)  # (M, K), column order = (kh, kw, cin)

    # weight (Cout, Cin, KH, KW) -> (KH, KW, Cin, Cout) -> (K, Cout) matching taps.
    w_mat = jnp.transpose(w_eff, (2, 3, 1, 0)).reshape(K, Cout).astype(compute_dtype)
    b_vec = (b_eff if b_eff is not None
             else jnp.zeros((Cout,), jnp.float32)).reshape(1, Cout)

    # Lane-dense padding of the *small* operands only (Cout -> multiple of 128).
    # The big taps slab keeps its natural K (block last dim == full array dim).
    Coutp = _round_up(Cout, 128)
    in_sz = jnp.dtype(compute_dtype).itemsize
    out_sz = jnp.dtype(out_dtype).itemsize

    # ---- gen-aware tile selection from an explicit VMEM budget ----
    vmem_cap = _vmem_capacity_bytes()
    vmem_budget = int(0.70 * vmem_cap)               # headroom for compiler scratch
    tn = min(Coutp, max(128, _round_up(tile_n, 128)))
    n_ct = Coutp // tn
    w_bufs = 1 if n_ct == 1 else 2                   # weight/bias resident when 1 Cout tile
    taps_bufs = 3 if vmem_cap >= (96 << 20) else 2   # deeper taps pipeline on 128 MiB chips

    if M <= 256:
        tm = _round_up(M, 8)
    else:
        fixed = w_bufs * K * tn * in_sz + 8 * tn * 4          # weight + bias blocks
        per_row = taps_bufs * K * in_sz + 2 * tn * out_sz     # taps + output blocks
        tm_vmem = max(256, (max(0, vmem_budget - fixed) // per_row) // 256 * 256)
        tm_steps = max(256, _round_up(pl.cdiv(M, 8), 256))    # >= ~8 M-steps (pipelining/megacore)
        tm = min(_round_up(M, 256), tile_m, tm_vmem, tm_steps)
    Mp = _round_up(M, tm)

    if Mp != M:
        taps = jnp.pad(taps, ((0, Mp - M), (0, 0)))
    w_p = jnp.pad(w_mat, ((0, 0), (0, Coutp - Cout)))
    b_p = jnp.pad(b_vec, ((0, 0), (0, Coutp - Cout)))

    grid = (Mp // tm, n_ct)  # Cout innermost -> taps block index constant across it
    cost = pl.CostEstimate(
        flops=2 * Mp * K * Coutp,
        transcendentals=0,
        bytes_accessed=(Mp * K + K * Coutp) * in_sz + Coutp * 4 + Mp * Coutp * out_sz,
    )

    out_p = pl.pallas_call(
        _conv_mtl_kernel,
        out_shape=jax.ShapeDtypeStruct((Mp, Coutp), out_dtype),
        grid_spec=pltpu.PrefetchScalarGridSpec(
            num_scalar_prefetch=0,
            grid=grid,
            in_specs=[
                pl.BlockSpec((tm, K), lambda i, j: (i, 0),
                             pipeline_mode=pl.Buffered(taps_bufs)),  # streamed taps
                pl.BlockSpec((K, tn), lambda i, j: (0, j),
                             pipeline_mode=pl.Buffered(w_bufs)),     # (near-)resident weight
                pl.BlockSpec((1, tn), lambda i, j: (0, j),
                             pipeline_mode=pl.Buffered(w_bufs)),     # folded bias
            ],
            out_specs=pl.BlockSpec((tm, tn), lambda i, j: (i, j)),
        ),
        compiler_params=pltpu.CompilerParams(
            dimension_semantics=("parallel", "parallel"),
            vmem_limit_bytes=int(min(0.85 * vmem_cap, 100 * 2 ** 20)),
        ),
        cost_estimate=cost,
    )(taps, w_p, b_p)

    out = out_p[:M, :Cout].reshape(N, OH, OW, Cout)
    # Back to NCHW to match the PyTorch module contract.
    # TODO(synk): if downstream consumers accept NHWC, drop this transpose (it
    # is a pure-layout extra HBM read+write of the output).
    return jnp.transpose(out, (0, 3, 1, 2))


# ---------------------------------------------------------------------------
# Reference (plain JAX) for correctness check
# ---------------------------------------------------------------------------
def conv2d_mtl_reference(x, weight, mtl_weight, bias, mtl_bias, *,
                         stride=1, padding=0, dilation=1, groups=1, MTL=False):
    stride, padding, dilation = _pair(stride), _pair(padding), _pair(dilation)
    if MTL:
        new_w = weight * jnp.broadcast_to(mtl_weight, weight.shape)
        new_b = bias + mtl_bias if bias is not None else None
    else:
        new_w, new_b = weight, bias
    out = lax.conv_general_dilated(
        x, new_w, window_strides=stride,
        padding=[(padding[0], padding[0]), (padding[1], padding[1])],
        rhs_dilation=dilation, feature_group_count=groups,
        dimension_numbers=("NCHW", "OIHW", "NCHW"))
    if new_b is not None:
        out = out + new_b[None, :, None, None]
    return out


if __name__ == "__main__":
    # Module config: Conv2dMtl(4, 8, kernel_size=3, stride=1, padding=1, bias=True, MTL=True)
    N, Cin, Cout, H, W = 2, 4, 8, 16, 16
    KH = KW = 3
    stride, padding, dilation, groups = 1, 1, 1, 1

    key = jax.random.PRNGKey(0)
    k_x, k_w, k_b, k_mw, k_mb = jax.random.split(key, 5)

    # reset_parameters(): stdv = 1 / sqrt(in_channels * prod(kernel_size))
    stdv = 1.0 / math.sqrt(Cin * KH * KW)
    weight = jax.random.uniform(k_w, (Cout, Cin, KH, KW), jnp.float32,
                                minval=-stdv, maxval=stdv)
    bias = jax.random.uniform(k_b, (Cout,), jnp.float32, minval=-stdv, maxval=stdv)
    # mtl params are 1 / 0 after reset_parameters; use non-trivial deterministic
    # values here so the MTL scaling path is actually exercised.
    mtl_weight = 1.0 + 0.1 * jax.random.normal(k_mw, (Cout, Cin, 1, 1), jnp.float32)
    mtl_bias = 0.05 * jax.random.normal(k_mb, (Cout,), jnp.float32)
    x = jax.random.normal(k_x, (N, Cin, H, W), jnp.float32)

    ref = jax.block_until_ready(conv2d_mtl_reference(
        x, weight, mtl_weight, bias, mtl_bias, stride=stride, padding=padding,
        dilation=dilation, groups=groups, MTL=True))

    # Default (bf16 compute, f32 accumulate) path.
    out = jax.block_until_ready(conv2d_mtl_forward(
        x, weight, mtl_weight, bias, mtl_bias, stride=stride, padding=padding,
        dilation=dilation, groups=groups, MTL=True))
    assert out.shape == (N, Cout, H, W), out.shape
    assert jnp.allclose(out, ref, rtol=3e-2, atol=3e-2), \
        float(jnp.max(jnp.abs(out - ref)))

    # f32 compute path (tight check of the kernel math).
    out_f32 = jax.block_until_ready(conv2d_mtl_forward(
        x, weight, mtl_weight, bias, mtl_bias, stride=stride, padding=padding,
        dilation=dilation, groups=groups, MTL=True, compute_dtype=jnp.float32))
    assert jnp.allclose(out_f32, ref, rtol=1e-3, atol=1e-3), \
        float(jnp.max(jnp.abs(out_f32 - ref)))

    # MTL=False path (mtl params ignored).
    ref_nf = jax.block_until_ready(conv2d_mtl_reference(
        x, weight, mtl_weight, bias, mtl_bias, stride=stride, padding=padding,
        dilation=dilation, groups=groups, MTL=False))
    out_nf = jax.block_until_ready(conv2d_mtl_forward(
        x, weight, mtl_weight, bias, mtl_bias, stride=stride, padding=padding,
        dilation=dilation, groups=groups, MTL=False))
    assert jnp.allclose(out_nf, ref_nf, rtol=3e-2, atol=3e-2)

    print("KERNEL_OK")
</pallas_src>

<mosaic_0001>
module attributes {stable_mosaic.version = 11 : i64} {
  func.func @_conv_mtl_kernel(%arg0: i32, %arg1: i32, %arg2: memref<256x36xbf16, #tpu.memory_space<vmem>>, %arg3: memref<36x128xbf16, #tpu.memory_space<vmem>>, %arg4: memref<1x128xf32, #tpu.memory_space<vmem>>, %arg5: memref<256x128xf32, #tpu.memory_space<vmem>>) attributes {dimension_semantics = [#tpu.dimension_semantics<parallel>, #tpu.dimension_semantics<parallel>], iteration_bounds = array<i64: 2, 1>, scalar_prefetch = 0 : i64, scratch_operands = 0 : i64, tpu.core_type = #tpu.core_type<tc>, window_params = [{pipeline_mode = #tpu.pipeline_mode<double_buffered>, transform_indices = @transform_0, window_bounds = array<i64: 256, 36>}, {pipeline_mode = #tpu.pipeline_mode<synchronous>, transform_indices = @transform_1, window_bounds = array<i64: 36, 128>}, {pipeline_mode = #tpu.pipeline_mode<synchronous>, transform_indices = @transform_2, window_bounds = array<i64: 1, 128>}, {transform_indices = @transform_3, window_bounds = array<i64: 256, 128>}]} {
    %c0 = arith.constant 0 : index
    %c0_0 = arith.constant 0 : index
    %0 = vector.load %arg2[%c0, %c0_0] : memref<256x36xbf16, #tpu.memory_space<vmem>>, vector<256x36xbf16>
    %c0_1 = arith.constant 0 : index
    %c0_2 = arith.constant 0 : index
    %1 = vector.load %arg3[%c0_1, %c0_2] : memref<36x128xbf16, #tpu.memory_space<vmem>>, vector<36x128xbf16>
    %cst = arith.constant dense<0.000000e+00> : vector<256x128xf32>
    %2 = tpu.matmul %0, %1, %cst {dimension_numbers = #tpu.dot_dimension_numbers<[1], [0], [0], [1], [0, 0, 1, 1], [], []>} : vector<256x36xbf16>, vector<36x128xbf16>, vector<256x128xf32> -> vector<256x128xf32>
    %c0_3 = arith.constant 0 : index
    %c0_4 = arith.constant 0 : index
    %3 = vector.load %arg4[%c0_3, %c0_4] : memref<1x128xf32, #tpu.memory_space<vmem>>, vector<1x128xf32>
    %4 = vector.broadcast %3 : vector<1x128xf32> to vector<256x128xf32>
    %5 = arith.addf %2, %4 : vector<256x128xf32>
    %c0_5 = arith.constant 0 : index
    %c0_6 = arith.constant 0 : index
    %6 = vector.load %arg5[%c0_5, %c0_6] : memref<256x128xf32, #tpu.memory_space<vmem>>, vector<256x128xf32>
    tpu.vector_store %arg5[%c0_5, %c0_6], %5 {strides = array<i32>} : memref<256x128xf32, #tpu.memory_space<vmem>>, vector<256x128xf32>,
    return
  }
  func.func @transform_0(%arg0: i32, %arg1: i32) -> (i32, i32) {
    %c0_i32 = arith.constant 0 : i32
    %c0_i32_0 = arith.constant 0 : i32
    return %arg0, %c0_i32 : i32, i32
  }
  func.func @transform_1(%arg0: i32, %arg1: i32) -> (i32, i32) {
    %c0_i32 = arith.constant 0 : i32
    %c0_i32_0 = arith.constant 0 : i32
    return %c0_i32, %arg1 : i32, i32
  }
  func.func @transform_2(%arg0: i32, %arg1: i32) -> (i32, i32) {
    %c0_i32 = arith.constant 0 : i32
    %c0_i32_0 = arith.constant 0 : i32
    return %c0_i32, %arg1 : i32, i32
  }
  func.func @transform_3(%arg0: i32, %arg1: i32) -> (i32, i32) {
    %c0_i32 = arith.constant 0 : i32
    return %arg0, %arg1 : i32, i32
  }
}

</mosaic_0001>

<bundles_post_ra>
// kernel: tpu_custom_call.1
= control target key start
LH: loop header
LB: loop body
LE: loop exit
PB: predicated region body
PF: predicated region fallthrough
CT: control target
= control target key end

     0   :  { %8 = vsyncpa [#allocation3], 0  ;;  %s1150_s0 = inlined_call_operand.vmem [shape: bf16[512,36], index: 0, kind: input, shape index: {}]   ;;  %s1151_s1 = inlined_call_operand.vmem [shape: bf16[36,128], index: 1, kind: input, shape index: {}]   ;;  %s1152_s2 = inlined_call_operand.vmem [shape: f32[1,128], index: 2, kind: input, shape index: {}]   ;;  %s1153_s3 = inlined_call_operand.hbm [shape: f32[512,128], index: 3, kind: output, shape index: {}]  }
   0x1   :  { %10 = vsyncpa [#allocation3 + $0x1], 0  ;;  %s935_s12 = smov 0   ;;  %s937_s13 = smov 0  }
   0x2   :  { %s939_s14 = smov 0   ;;  %s941_s15 = smov 0  }
   0x3   :  { %s943_s16 = smov 0   ;;  %s945_s17 = smov 0  }
   0x4 LB: > { %s644_s18 = sadd.s32 4294967295, %s911_s17   ;;  %s645_s19 = sadd.s32 4294967294, %s911_s17   ;;  %s911_s17 = sphi %s945_s17, %s16_s17   ;;  %s907_s16 = sphi %s943_s16, %s1160_s16   ;;  %s903_s15 = sphi %s941_s15, %s1159_s15   ;;  %s899_s14 = sphi %s939_s14, %s1158_s14   ;;  %s895_s13 = sphi %s937_s13, %s1157_s13   ;;  %s891_s12 = sphi %s935_s12, %s1156_s12  }
   0x5   : > { %s28_s20 = sadd.s32 1, %s907_s16  ;;  %s115_s21 = sadd.s32 1, %s899_s14 }
   0x6   : > { %p30_p0 = scmp.ge.s32.totalorder %s28_s20, 2  ;;  %p125_p1 = scmp.ne.s32.totalorder %s899_s14, %s895_s13 }
   0x7   : > { %p126_p2 = scmp.eq.s32.totalorder %s644_s18, 1  ;;  %p131_p3 = scmp.ne.s32.totalorder %s895_s13, %s891_s12 }
   0x8   : > { %s1162_s20 = smov (%p30_p0, %s28_s20), 0  ;;  %p132_p5 = scmp.eq.s32.totalorder %s645_s19, 1 }
   0x9   : > { %p975_p4 = por %p126_p2, %p125_p1  ;;  %s110_s23 = ssub.s32 %s907_s16, %s1162_s20 }
   0xa   : > { %p650_p6 = scmp.ge.s32.totalorder %s911_s17, 1  ;;  %p113_p7 = scmp.eq.s32.totalorder %s110_s23, 0 }
   0xb   : > { %p982_p8 = por %p132_p5, %p131_p3  ;;  %p172_p9 = scmp.lt.s32.totalorder %s911_s17, 3 }
   0xc   : > { %s988_s25 = scalar_select %p113_p7, %s899_s14, %s115_s21  }
   0xd   : > { %p173_p10 = pnand %p650_p6, %p172_p9 }
   0xe   : > { %s652_s28 = sshll.u32 (!%p173_p10), %s903_s15, 5  ;;  %s200_s10 = sand.u32 (!%p173_p10), 1, %s895_s13  }
   0xf   : > { %176 = sbr.rel (%p173_p10) target bundleno = 233 (0xe9), region = 32  ;;  %p204_p11 = scmp.lt.s32.totalorder (!%p173_p10), %s652_s28, 63 }
  0x10   : > { %s651_s11 = sshll.u32 (!%p173_p10), %s200_s10, 8  ;;  %s765_s23 = sshll.u32 (!%p173_p10), %s903_s15, 8 }
  0x11   : > { %s1047_s21 = scalar_lea.vmem (!%p173_p10), [#allocation2], %s651_s11  ;;  %s529_s30 = scalar_lea.sflag (!%p173_p10), [#allocation3], %s200_s10 }
  0x12   : > { %s542_s15 = sshll.u32 (!%p173_p10), %s1047_s21, 4  ;;  %s853_s8 = scalar_lea.hbm (!%p173_p10), %s1153_s3, 512  ;;  %s543_s15 = int_to_ptr.vmem [resolvable:$true] %s542_s15 }
  0x14   : > { %v254_v0 = vld [vmem:[%s1151_s1 + $0x10] sm:$0x3]  ;;  %vm403_vm0 = vcmask 1041408   ;;  %s1164_s28 = smov (!%p204_p11, %s652_s28), 63  ;;  %v764_v4 = vld [vmem:[%s1151_s1 + $0x8] sm:$0xff]  ;;  %v763_v5 = vld [vmem:[%s1151_s1] sm:$0xff] }
  0x15   : > { %v348_v1 = vunpack.c.l.b16 %v254_v0  ;;  %s653_s4 = sshll.u32 %s1164_s28, 2  ;;  %vm354_vm1 = vcmask 293888   ;;  %v1043_v22 = vld [vmem:[%s1152_s2] ss:$0 sm:$0xff]  ;;  %s541_s28 = scalar_lea.hbm %s1153_s3, %s765_s23 }
  0x16   : > { %s1003_s9 = scalar_lea.vmem %s1150_s0, %s653_s4  ;;  %s544_s29 = sshll.u32 %s541_s28, 4  ;;  %s545_s29 = int_to_ptr.hbm [resolvable:$true] %s544_s29 }
  0x17   : > { %v351_v2 = vpack.c.b16 %v348_v1, %v348_v1  ;;  %v747_v6 = vld [vmem:[%s1003_s9] sm:$0xff]  ;;  %v748_v10 = vld [vmem:[%s1003_s9 + $0x8] sm:$0xff]  ;;  %v749_v14 = vld [vmem:[%s1003_s9 + $0x10] sm:$0xff]  ;;  %s847_s4 = sshra.s32 %s545_s29, 4  ;;  %s848_s4 = int_to_ptr.hbm [resolvable:$true] %s847_s4 }
  0x18   : > { %v751_v7 = vld [vmem:[%s1003_s9 + $0x20] sm:$0xff]  ;;  %v752_v11 = vld [vmem:[%s1003_s9 + $0x28] sm:$0xff]  ;;  %v753_v15 = vld [vmem:[%s1003_s9 + $0x30] sm:$0xff]  ;;  %s849_s5 = scalar_lea.hbm %s848_s4, 256  ;;  %p854_p1 = scmp.lt.s32.totalorder %s848_s4, %s1153_s3 }
  0x19   : > { %v405_v3 = vsel %vm403_vm0, %v351_v2, 0  ;;  %v755_v8 = vld [vmem:[%s1003_s9 + $0x40] sm:$0xff]  ;;  %v756_v12 = vld [vmem:[%s1003_s9 + $0x48] sm:$0xff]  ;;  %v757_v16 = vld [vmem:[%s1003_s9 + $0x50] sm:$0xff]  ;;  %p850_p12 = scmp.ne.s32.totalorder %s848_s4, %s849_s5  ;;  %p855_p2 = scmp.lt.s32.totalorder %s853_s8, %s849_s5 }
  0x1a   : > { %412 = vmatpush.bf16.msra.mxu0 %v405_v3  ;;  %766 = vmatpush.bf16.msra.mxu1 %v405_v3  ;;  %v759_v9 = vld [vmem:[%s1003_s9 + $0x60] sm:$0xff]  ;;  %v760_v13 = vld [vmem:[%s1003_s9 + $0x68] sm:$0xff]  ;;  %v761_v17 = vld [vmem:[%s1003_s9 + $0x70] sm:$0xff] }
  0x1b   : > { %767 = vmatpush.bf16.msra.mxu2 %v405_v3  ;;  %768 = vmatpush.bf16.msra.mxu3 %v405_v3  ;;  %v750_v18 = vld [vmem:[%s1003_s9 + $0x18] sm:$0xff]  ;;  %p851_p13 = pnand %p850_p12, %p975_p4  ;;  %p856_p3 = por %p855_p2, %p854_p1 }
  0x1c   : > { %v754_v19 = vld [vmem:[%s1003_s9 + $0x38] sm:$0xff] }
  0x1d   : > { %v758_v20 = vld [vmem:[%s1003_s9 + $0x58] sm:$0xff]  ;;  %p852_p0 = pneg %p851_p13 }
  0x1e   : > { %413 = vmatpush.bf16.msra.mxu0 %v764_v4  ;;  %769 = vmatpush.bf16.msra.mxu1 %v764_v4  ;;  %v762_v21 = vld [vmem:[%s1003_s9 + $0x78] sm:$0xff] }
  0x1f   : > { %770 = vmatpush.bf16.msra.mxu2 %v764_v4  ;;  %771 = vmatpush.bf16.msra.mxu3 %v764_v4  ;;  %p857_p5 = pnand %p856_p3, %p852_p0 }
  0x22   : > { %414 = vmatpush.bf16.msra.mxu0 %v763_v5  ;;  %772 = vmatpush.bf16.msra.mxu1 %v763_v5 }
  0x23   : > { %773 = vmatpush.bf16.msra.mxu2 %v763_v5  ;;  %774 = vmatpush.bf16.msra.mxu3 %v763_v5 }
  0x25   : > { %726 = vmatmul.msk.bf16.vlgmr.msra.gmra.mxu0 %vm354_vm1, %v747_v6  ;;  %730 = vmatmul.msk.bf16.vlgmr.msra.gmra.mxu1 %vm354_vm1, %v751_v7 }
  0x26   : > { %734 = vmatmul.msk.bf16.vlgmr.msra.gmra.mxu2 %vm354_vm1, %v755_v8  ;;  %738 = vmatmul.msk.bf16.vlgmr.msra.gmra.mxu3 %vm354_vm1, %v759_v9 }
  0x35   : > { %727 = vmatmul.msk.bf16.gmra.mxu0 %vm354_vm1, %v748_v10  ;;  %731 = vmatmul.msk.bf16.gmra.mxu1 %vm354_vm1, %v752_v11 }
  0x36   : > { %735 = vmatmul.msk.bf16.gmra.mxu2 %vm354_vm1, %v756_v12  ;;  %739 = vmatmul.msk.bf16.gmra.mxu3 %vm354_vm1, %v760_v13 }
  0x45   : > { %728 = vmatmul.msk.bf16.gmra.mxu0 %vm354_vm1, %v749_v14  ;;  %732 = vmatmul.msk.bf16.gmra.mxu1 %vm354_vm1, %v753_v15 }
  0x46   : > { %736 = vmatmul.msk.bf16.gmra.mxu2 %vm354_vm1, %v757_v16  ;;  %740 = vmatmul.msk.bf16.gmra.mxu3 %vm354_vm1, %v761_v17 }
  0x55   : > { %729 = vmatmul.msk.bf16.gmra.mxu0 %vm354_vm1, %v750_v18  ;;  %733 = vmatmul.msk.bf16.gmra.mxu1 %vm354_vm1, %v754_v19 }
  0x56   : > { %737 = vmatmul.msk.bf16.gmra.mxu2 %vm354_vm1, %v758_v20  ;;  %741 = vmatmul.msk.bf16.gmra.mxu3 %vm354_vm1, %v762_v21 }
  0xa2   : > { %v416_v23 = vpop.f32.mrf.mxu0  ;;  %v436_v24 = vpop.f32.mrf.mxu1 }
  0xa3   : > { %v417_v25 = vadd.f32 %v1043_v22, %v416_v23  ;;  %v437_v26 = vadd.f32 %v1043_v22, %v436_v24 }
  0xa5   : > { %496 = vst [vmem:[%s1047_s21] sm:$0xff] %v417_v25 }
  0xa6   : > { %504 = vst [vmem:[%s1047_s21 + $0x40] sm:$0xff] %v437_v26 }
  0xa9   : > { %v456_v27 = vpop.f32.mrf.mxu2  ;;  %v476_v28 = vpop.f32.mrf.mxu3 }
  0xaa   : > { %v457_v29 = vadd.f32 %v1043_v22, %v456_v27  ;;  %v477_v30 = vadd.f32 %v1043_v22, %v476_v28  ;;  %v418_v31 = vpop.f32.mrf.mxu0  ;;  %v438_v32 = vpop.f32.mrf.mxu1 }
  0xab   : > { %v419_v33 = vadd.f32 %v1043_v22, %v418_v31  ;;  %v439_v34 = vadd.f32 %v1043_v22, %v438_v32 }
  0xac   : > { %512 = vst [vmem:[%s1047_s21 + $0x80] sm:$0xff] %v457_v29 }
  0xad   : > { %520 = vst [vmem:[%s1047_s21 + $0xc0] sm:$0xff] %v477_v30 }
  0xae   : > { %497 = vst [vmem:[%s1047_s21 + $0x8] sm:$0xff] %v419_v33 }
  0xaf   : > { %505 = vst [vmem:[%s1047_s21 + $0x48] sm:$0xff] %v439_v34 }
  0xb1   : > { %v458_v35 = vpop.f32.mrf.mxu2  ;;  %v478_v36 = vpop.f32.mrf.mxu3 }
  0xb2   : > { %v459_v37 = vadd.f32 %v1043_v22, %v458_v35  ;;  %v479_v38 = vadd.f32 %v1043_v22, %v478_v36  ;;  %v421_v39 = vpop.f32.mrf.mxu0  ;;  %v441_v40 = vpop.f32.mrf.mxu1 }
  0xb3   : > { %v422_v41 = vadd.f32 %v1043_v22, %v421_v39  ;;  %v442_v42 = vadd.f32 %v1043_v22, %v441_v40 }
  0xb4   : > { %513 = vst [vmem:[%s1047_s21 + $0x88] sm:$0xff] %v459_v37 }
  0xb5   : > { %521 = vst [vmem:[%s1047_s21 + $0xc8] sm:$0xff] %v479_v38 }
  0xb6   : > { %498 = vst [vmem:[%s1047_s21 + $0x10] sm:$0xff] %v422_v41 }
  0xb7   : > { %506 = vst [vmem:[%s1047_s21 + $0x50] sm:$0xff] %v442_v42 }
  0xb9   : > { %v461_v43 = vpop.f32.mrf.mxu2  ;;  %v481_v44 = vpop.f32.mrf.mxu3 }
  0xba   : > { %v462_v45 = vadd.f32 %v1043_v22, %v461_v43  ;;  %v482_v46 = vadd.f32 %v1043_v22, %v481_v44  ;;  %v423_v47 = vpop.f32.mrf.mxu0  ;;  %v443_v48 = vpop.f32.mrf.mxu1 }
  0xbb   : > { %v424_v49 = vadd.f32 %v1043_v22, %v423_v47  ;;  %v444_v50 = vadd.f32 %v1043_v22, %v443_v48 }
  0xbc   : > { %514 = vst [vmem:[%s1047_s21 + $0x90] sm:$0xff] %v462_v45 }
  0xbd   : > { %522 = vst [vmem:[%s1047_s21 + $0xd0] sm:$0xff] %v482_v46 }
  0xbe   : > { %499 = vst [vmem:[%s1047_s21 + $0x18] sm:$0xff] %v424_v49 }
  0xbf   : > { %507 = vst [vmem:[%s1047_s21 + $0x58] sm:$0xff] %v444_v50 }
  0xc1   : > { %v463_v51 = vpop.f32.mrf.mxu2  ;;  %v483_v52 = vpop.f32.mrf.mxu3 }
  0xc2   : > { %v464_v53 = vadd.f32 %v1043_v22, %v463_v51  ;;  %v484_v54 = vadd.f32 %v1043_v22, %v483_v52  ;;  %v426_v55 = vpop.f32.mrf.mxu0  ;;  %v446_v56 = vpop.f32.mrf.mxu1 }
  0xc3   : > { %v427_v57 = vadd.f32 %v1043_v22, %v426_v55  ;;  %v447_v58 = vadd.f32 %v1043_v22, %v446_v56 }
  0xc4   : > { %515 = vst [vmem:[%s1047_s21 + $0x98] sm:$0xff] %v464_v53 }
  0xc5   : > { %523 = vst [vmem:[%s1047_s21 + $0xd8] sm:$0xff] %v484_v54 }
  0xc6   : > { %500 = vst [vmem:[%s1047_s21 + $0x20] sm:$0xff] %v427_v57 }
  0xc7   : > { %508 = vst [vmem:[%s1047_s21 + $0x60] sm:$0xff] %v447_v58 }
  0xc9   : > { %v466_v59 = vpop.f32.mrf.mxu2  ;;  %v486_v60 = vpop.f32.mrf.mxu3 }
  0xca   : > { %v467_v61 = vadd.f32 %v1043_v22, %v466_v59  ;;  %v487_v62 = vadd.f32 %v1043_v22, %v486_v60  ;;  %v428_v63 = vpop.f32.mrf.mxu0  ;;  %v448_v0 = vpop.f32.mrf.mxu1 }
  0xcb   : > { %v429_v1 = vadd.f32 %v1043_v22, %v428_v63  ;;  %v449_v2 = vadd.f32 %v1043_v22, %v448_v0 }
  0xcc   : > { %516 = vst [vmem:[%s1047_s21 + $0xa0] sm:$0xff] %v467_v61 }
  0xcd   : > { %524 = vst [vmem:[%s1047_s21 + $0xe0] sm:$0xff] %v487_v62 }
  0xce   : > { %501 = vst [vmem:[%s1047_s21 + $0x28] sm:$0xff] %v429_v1 }
  0xcf   : > { %509 = vst [vmem:[%s1047_s21 + $0x68] sm:$0xff] %v449_v2 }
  0xd1   : > { %v468_v3 = vpop.f32.mrf.mxu2  ;;  %v488_v4 = vpop.f32.mrf.mxu3 }
  0xd2   : > { %v469_v5 = vadd.f32 %v1043_v22, %v468_v3  ;;  %v489_v6 = vadd.f32 %v1043_v22, %v488_v4  ;;  %v431_v7 = vpop.f32.mrf.mxu0  ;;  %v451_v8 = vpop.f32.mrf.mxu1 }
  0xd3   : > { %v432_v9 = vadd.f32 %v1043_v22, %v431_v7  ;;  %v452_v10 = vadd.f32 %v1043_v22, %v451_v8 }
  0xd4   : > { %517 = vst [vmem:[%s1047_s21 + $0xa8] sm:$0xff] %v469_v5 }
  0xd5   : > { %525 = vst [vmem:[%s1047_s21 + $0xe8] sm:$0xff] %v489_v6 }
  0xd6   : > { %502 = vst [vmem:[%s1047_s21 + $0x30] sm:$0xff] %v432_v9 }
  0xd7   : > { %510 = vst [vmem:[%s1047_s21 + $0x70] sm:$0xff] %v452_v10 }
  0xd9   : > { %v471_v11 = vpop.f32.mrf.mxu2  ;;  %v491_v12 = vpop.f32.mrf.mxu3 }
  0xda   : > { %v472_v13 = vadd.f32 %v1043_v22, %v471_v11  ;;  %v492_v14 = vadd.f32 %v1043_v22, %v491_v12  ;;  %v433_v15 = vpop.f32.mrf.mxu0  ;;  %v453_v16 = vpop.f32.mrf.mxu1 }
  0xdb   : > { %v434_v17 = vadd.f32 %v1043_v22, %v433_v15  ;;  %v454_v18 = vadd.f32 %v1043_v22, %v453_v16 }
  0xdc   : > { %518 = vst [vmem:[%s1047_s21 + $0xb0] sm:$0xff] %v472_v13 }
  0xdd   : > { %526 = vst [vmem:[%s1047_s21 + $0xf0] sm:$0xff] %v492_v14 }
  0xde   : > { %503 = vst [vmem:[%s1047_s21 + $0x38] sm:$0xff] %v434_v17 }
  0xdf   : > { %511 = vst [vmem:[%s1047_s21 + $0x78] sm:$0xff] %v454_v18 }
  0xe1   : > { %v473_v19 = vpop.f32.mrf.mxu2  ;;  %v493_v20 = vpop.f32.mrf.mxu3 }
  0xe2   : > { %v474_v21 = vadd.f32 %v1043_v22, %v473_v19  ;;  %v494_v23 = vadd.f32 %v1043_v22, %v493_v20 }
  0xe4   : > { %519 = vst [vmem:[%s1047_s21 + $0xb8] sm:$0xff] %v474_v21 }
  0xe5   : > { %527 = vst [vmem:[%s1047_s21 + $0xf8] sm:$0xff] %v494_v23 }
  0xe6   : > { %860 = shalt.err (!%p857_p5)
}
  0xe7   : > { %s913_s10 = smov 128   ;;  %s914_s18 = smov 8  }
  0xe8   : > { %775 = dma.vmem_to_hbm [thread:$0]  (%p975_p4), %s543_s15, 4096, %s545_s29, %s529_s30, %s913_s10, %s913_s10, %s914_s18  }
  0xe9 PF: > { %p781_p6 = scmp.ge.s32.totalorder %s911_s17, 2  ;;  %s559_s19 = sand.u32 1, %s891_s12  }
  0xea   : > { %s560_s21 = scalar_lea.sflag [#allocation3], %s559_s19 }
  0xeb   : > { %p778_p7 = pnand %p781_p6, %p982_p8 }
  0xed   : > { %p779_p9 = pneg %p778_p7 }
  0xef   : > { %886 = dma.done.wait (%p779_p9), %s560_s21, 4096  }
  0xf0   : > { %888 = vsyncadd (%p779_p9), %s560_s21, 4294963200  ;;  %s16_s17 = sadd.s32 1, %s911_s17   ;;  %s1156_s12 = smov %s895_s13 }
  0xf1   : > { %p13_p10 = scmp.ge.s32.totalorder %s16_s17, 4   ;;  %s1157_s13 = smov %s899_s14 }
  0xf2   : > { %s1158_s14 = smov %s988_s25  ;;  %s1159_s15 = smov %s907_s16 }
  0xf3   : > { %s1160_s16 = smov %s1162_s20  ;;  %15 = sbr.rel (!%p13_p10) target bundleno = 4 (0x4), region = 73 }
  0xf8   :  { %566 = vsyncpa [#allocation3], 1 }
  0xf9   :  { %568 = vsyncpa [#allocation3 + $0x1], 1 }

</bundles_post_ra>
